<compile_context>
chip_gen: v7x
topology: tpu7x:2x2x1
jax: 0.10.0
libtpu: 0.0.40
codegen_flags: <defaults>
</compile_context>

<pallas_src>
import functools

import jax
import jax.numpy as jnp
from jax import lax
from jax.experimental import pallas as pl
from jax.experimental.pallas import tpu as pltpu


def fire_kernel(x_ref, mask_ref, wsq_ref, bsq_ref, wex_ref, bex_ref, out_ref, *, H, W):
    # x_ref:    (1, Cin, H*W)          one NCHW image, spatial flattened onto lanes
    # mask_ref: (9, H*W)               per-tap boundary masks (precomputed in wrapper)
    # wsq_ref:  (Csq, Cin)   bsq_ref:  (Csq, 1)        [BN folded]
    # wex_ref:  (2*C2, 9*Csq) bex_ref: (2*C2, 1)       [expand_1x1 + expand_3x3, BN folded]
    # out_ref:  (1, 2*C2, H*W)         channels = [expand_1x1 | expand_3x3]
    HW = H * W
    x = x_ref[0]                                                     # (Cin, HW)

    # --- squeeze: 1x1 conv (+ folded BN) + ReLU -------------------------------------
    s = jnp.dot(wsq_ref[...], x, preferred_element_type=jnp.float32) + bsq_ref[...]
    s = jnp.maximum(s, 0.0)                                          # (Csq, HW)

    # --- build im2col operand for the fused expand matmul ----------------------------
    # tap (dy, dx): shifted[:, p] = s[:, p + dy*W + dx] via a lane roll (XLU), with a
    # precomputed mask zeroing positions that fall outside the image (== zero padding).
    mask = mask_ref[...]                                             # (9, HW)
    taps = []
    t = 0
    for dy in (-1, 0, 1):
        for dx in (-1, 0, 1):
            off = dy * W + dx
            if off == 0:
                shifted = s                                          # center tap, mask == 1
            else:
                shifted = pltpu.roll(s, shift=(-off) % HW, axis=1)
                shifted = shifted * mask[t:t + 1, :]
            taps.append(shifted)
            t += 1
    x9 = jnp.concatenate(taps, axis=0)                               # (9*Csq, HW), tile-aligned

    # --- fused expand_1x1 + expand_3x3: single K=9*Csq matmul (+ folded BN) + ReLU ---
    out = jnp.dot(wex_ref[...], x9, preferred_element_type=jnp.float32) + bex_ref[...]
    out_ref[0] = jnp.maximum(out, 0.0).astype(out_ref.dtype)         # lane-dense store


def fire_pallas_nchw(x_nchw, mask9, wsq_k, bsq_k, wex_k, bex_k):
    N, Cin, H, W = x_nchw.shape
    HW = H * W
    Csq = wsq_k.shape[0]
    Cout = wex_k.shape[0]
    x_flat = x_nchw.reshape(N, Cin, HW)          # contiguous reshape: no HBM traffic
    out_flat = pl.pallas_call(
        functools.partial(fire_kernel, H=H, W=W),
        out_shape=jax.ShapeDtypeStruct((N, Cout, HW), jnp.float32),
        grid=(N,),
        in_specs=[
            pl.BlockSpec((1, Cin, HW), lambda n: (n, 0, 0)),
            pl.BlockSpec((9, HW), lambda n: (0, 0)),
            pl.BlockSpec((Csq, Cin), lambda n: (0, 0)),
            pl.BlockSpec((Csq, 1), lambda n: (0, 0)),
            pl.BlockSpec((Cout, 9 * Csq), lambda n: (0, 0)),
            pl.BlockSpec((Cout, 1), lambda n: (0, 0)),
        ],
        out_specs=pl.BlockSpec((1, Cout, HW), lambda n: (n, 0, 0)),
        compiler_params=pltpu.CompilerParams(
            dimension_semantics=("parallel",),
            vmem_limit_bytes=32 * 1024 * 1024,
        ),
    )(x_flat, mask9, wsq_k, bsq_k, wex_k, bex_k)
    return out_flat.reshape(N, Cout, H, W)       # contiguous reshape: no HBM traffic


def fold_bn(w, b, gamma, beta, mean, var, eps=1e-5):
    """Fold eval-mode BatchNorm into a conv whose output channels are the LAST dim of w."""
    scale = gamma / jnp.sqrt(var + eps)
    return w * scale, (b - mean) * scale + beta


def build_kernel_params(wsq, bsq, w1, b1, w3, b3):
    """Convert folded (out-channel-last) params into the channels-major kernel layout."""
    Cin, Csq = wsq.shape
    C2 = w1.shape[1]
    wsq_k = wsq.T                                            # (Csq, Cin)
    bsq_k = bsq.reshape(Csq, 1)
    w3_taps = w3.reshape(9, Csq, C2)                         # tap-major (ky, kx)
    w_left = jnp.zeros((9, Csq, C2), w1.dtype).at[4].set(w1)  # expand_1x1 lives on center tap
    w_big = jnp.concatenate([w_left.reshape(9 * Csq, C2),
                             w3_taps.reshape(9 * Csq, C2)], axis=1)   # (9*Csq, 2*C2)
    wex_k = w_big.T                                          # (2*C2, 9*Csq)
    bex_k = jnp.concatenate([b1, b3]).reshape(2 * C2, 1)
    return wsq_k, bsq_k, wex_k, bex_k


def build_tap_masks(H, W):
    """(9, H*W) f32 masks: 1 where the 3x3 tap stays inside the image (== zero padding)."""
    pos = jnp.arange(H * W, dtype=jnp.int32)
    hh, ww = pos // W, pos % W
    rows = []
    for dy in (-1, 0, 1):
        for dx in (-1, 0, 1):
            ok = (hh + dy >= 0) & (hh + dy < H) & (ww + dx >= 0) & (ww + dx < W)
            rows.append(ok.astype(jnp.float32))
    return jnp.stack(rows, axis=0)


def fire_ref_nchw(x_nchw, wsq, bsq, w1, b1, w3, b3):
    """Plain-JAX reference (highest precision) using the same folded parameters."""
    P = lax.Precision.HIGHEST
    x = jnp.transpose(x_nchw, (0, 2, 3, 1))
    N, H, W, _ = x.shape
    s = jnp.maximum(jnp.einsum('nhwc,cd->nhwd', x, wsq, precision=P) + bsq, 0.0)
    e1 = jnp.maximum(jnp.einsum('nhwc,cd->nhwd', s, w1, precision=P) + b1, 0.0)
    sp = jnp.pad(s, ((0, 0), (1, 1), (1, 1), (0, 0)))
    e3 = jnp.zeros_like(e1)
    for ky in range(3):
        for kx in range(3):
            e3 = e3 + jnp.einsum('nhwc,cd->nhwd', sp[:, ky:ky + H, kx:kx + W, :],
                                 w3[ky, kx], precision=P)
    e3 = jnp.maximum(e3 + b3, 0.0)
    return jnp.transpose(jnp.concatenate([e1, e3], axis=-1), (0, 3, 1, 2))


if __name__ == "__main__":
    # Fire(in_channel=4, out_channel=16, squzee_channel=8) on a (2, 4, 16, 16) NCHW input
    N, Cin, H, W = 2, 4, 16, 16
    Cout, Csq = 16, 8
    C2 = Cout // 2

    keys = jax.random.split(jax.random.PRNGKey(0), 20)
    x_nchw = jax.random.normal(keys[0], (N, Cin, H, W), jnp.float32)

    def bn_params(k0, k1, k2, k3, c):
        gamma = 1.0 + 0.1 * jax.random.normal(keys[k0], (c,), jnp.float32)
        beta = 0.1 * jax.random.normal(keys[k1], (c,), jnp.float32)
        mean = 0.1 * jax.random.normal(keys[k2], (c,), jnp.float32)
        var = 0.5 + jax.random.uniform(keys[k3], (c,), jnp.float32)
        return gamma, beta, mean, var

    # squeeze: Conv2d(Cin, Csq, 1) + BN(Csq)
    wsq_t = 0.2 * jax.random.normal(keys[1], (Csq, Cin, 1, 1), jnp.float32)
    bsq_t = 0.1 * jax.random.normal(keys[2], (Csq,), jnp.float32)
    g, b_, m, v = bn_params(3, 4, 5, 6, Csq)
    wsq, bsq = fold_bn(wsq_t[:, :, 0, 0].T, bsq_t, g, b_, m, v)       # (Cin,Csq),(Csq,)

    # expand_1x1: Conv2d(Csq, C2, 1) + BN(C2)
    w1_t = 0.2 * jax.random.normal(keys[7], (C2, Csq, 1, 1), jnp.float32)
    b1_t = 0.1 * jax.random.normal(keys[8], (C2,), jnp.float32)
    g, b_, m, v = bn_params(9, 10, 11, 12, C2)
    w1, b1 = fold_bn(w1_t[:, :, 0, 0].T, b1_t, g, b_, m, v)           # (Csq,C2),(C2,)

    # expand_3x3: Conv2d(Csq, C2, 3, padding=1) + BN(C2)
    w3_t = 0.2 * jax.random.normal(keys[13], (C2, Csq, 3, 3), jnp.float32)
    b3_t = 0.1 * jax.random.normal(keys[14], (C2,), jnp.float32)
    g, b_, m, v = bn_params(15, 16, 17, 18, C2)
    w3, b3 = fold_bn(jnp.transpose(w3_t, (2, 3, 1, 0)), b3_t, g, b_, m, v)  # (3,3,Csq,C2),(C2,)

    # --- pack parameters for the fused kernel and run (native NCHW, no transposes) ---
    wsq_k, bsq_k, wex_k, bex_k = build_kernel_params(wsq, bsq, w1, b1, w3, b3)
    mask9 = build_tap_masks(H, W)

    out_nchw = fire_pallas_nchw(x_nchw, mask9, wsq_k, bsq_k, wex_k, bex_k)
    jax.block_until_ready(out_nchw)

    # --- verify against plain-JAX reference ---
    ref_nchw = fire_ref_nchw(x_nchw, wsq, bsq, w1, b1, w3, b3)
    assert out_nchw.shape == (N, Cout, H, W)
    max_err = float(jnp.max(jnp.abs(out_nchw - ref_nchw)))
    assert jnp.allclose(out_nchw, ref_nchw, rtol=2e-3, atol=2e-3), max_err

    print("KERNEL_OK")
</pallas_src>

<mosaic_0001>
module attributes {stable_mosaic.version = 11 : i64} {
  func.func @fire_kernel(%arg0: i32, %arg1: memref<1x4x256xf32, #tpu.memory_space<vmem>>, %arg2: memref<9x256xf32, #tpu.memory_space<vmem>>, %arg3: memref<8x4xf32, #tpu.memory_space<vmem>>, %arg4: memref<8x1xf32, #tpu.memory_space<vmem>>, %arg5: memref<16x72xf32, #tpu.memory_space<vmem>>, %arg6: memref<16x1xf32, #tpu.memory_space<vmem>>, %arg7: memref<1x16x256xf32, #tpu.memory_space<vmem>>) attributes {dimension_semantics = [#tpu.dimension_semantics<parallel>], iteration_bounds = array<i64: 2>, scalar_prefetch = 0 : i64, scratch_operands = 0 : i64, tpu.core_type = #tpu.core_type<tc>, window_params = [{transform_indices = @transform_0, window_bounds = array<i64: 1, 4, 256>}, {pipeline_mode = #tpu.pipeline_mode<synchronous>, transform_indices = @transform_1, window_bounds = array<i64: 9, 256>}, {pipeline_mode = #tpu.pipeline_mode<synchronous>, transform_indices = @transform_2, window_bounds = array<i64: 8, 4>}, {pipeline_mode = #tpu.pipeline_mode<synchronous>, transform_indices = @transform_3, window_bounds = array<i64: 8, 1>}, {pipeline_mode = #tpu.pipeline_mode<synchronous>, transform_indices = @transform_4, window_bounds = array<i64: 16, 72>}, {pipeline_mode = #tpu.pipeline_mode<synchronous>, transform_indices = @transform_5, window_bounds = array<i64: 16, 1>}, {transform_indices = @transform_6, window_bounds = array<i64: 1, 16, 256>}]} {
    %c0 = arith.constant 0 : index
    %c0_0 = arith.constant 0 : index
    %c0_1 = arith.constant 0 : index
    %0 = vector.load %arg1[%c0, %c0_0, %c0_1] : memref<1x4x256xf32, #tpu.memory_space<vmem>>, vector<1x4x256xf32>
    %1 = vector.shape_cast %0 : vector<1x4x256xf32> to vector<4x256xf32>
    %c0_2 = arith.constant 0 : index
    %c0_3 = arith.constant 0 : index
    %2 = vector.load %arg3[%c0_2, %c0_3] : memref<8x4xf32, #tpu.memory_space<vmem>>, vector<8x4xf32>
    %cst = arith.constant dense<0.000000e+00> : vector<8x256xf32>
    %3 = tpu.matmul %2, %1, %cst {dimension_numbers = #tpu.dot_dimension_numbers<[1], [0], [0], [1], [0, 0, 1, 1], [], []>} : vector<8x4xf32>, vector<4x256xf32>, vector<8x256xf32> -> vector<8x256xf32>
    %c0_4 = arith.constant 0 : index
    %c0_5 = arith.constant 0 : index
    %4 = vector.load %arg4[%c0_4, %c0_5] : memref<8x1xf32, #tpu.memory_space<vmem>>, vector<8x1xf32>
    %5 = vector.broadcast %4 : vector<8x1xf32> to vector<8x256xf32>
    %6 = arith.addf %3, %5 : vector<8x256xf32>
    %cst_6 = arith.constant 0.000000e+00 : f32
    %7 = vector.broadcast %cst_6 : f32 to vector<8x256xf32>
    %8 = arith.maximumf %6, %7 : vector<8x256xf32>
    %c0_7 = arith.constant 0 : index
    %c0_8 = arith.constant 0 : index
    %9 = vector.load %arg2[%c0_7, %c0_8] : memref<9x256xf32, #tpu.memory_space<vmem>>, vector<9x256xf32>
    %c17_i32 = arith.constant 17 : i32
    %10 = tpu.dynamic_rotate %8 by %c17_i32 dim 1 : vector<8x256xf32>, i32 -> vector<8x256xf32>
    %11 = vector.extract_strided_slice %9 {offsets = [0, 0], sizes = [1, 256], strides = [1, 1]} : vector<9x256xf32> to vector<1x256xf32>
    %12 = vector.broadcast %11 : vector<1x256xf32> to vector<8x256xf32>
    %13 = arith.mulf %10, %12 : vector<8x256xf32>
    %c16_i32 = arith.constant 16 : i32
    %14 = tpu.dynamic_rotate %8 by %c16_i32 dim 1 : vector<8x256xf32>, i32 -> vector<8x256xf32>
    %15 = vector.extract_strided_slice %9 {offsets = [1, 0], sizes = [1, 256], strides = [1, 1]} : vector<9x256xf32> to vector<1x256xf32>
    %16 = vector.broadcast %15 : vector<1x256xf32> to vector<8x256xf32>
    %17 = arith.mulf %14, %16 : vector<8x256xf32>
    %c15_i32 = arith.constant 15 : i32
    %18 = tpu.dynamic_rotate %8 by %c15_i32 dim 1 : vector<8x256xf32>, i32 -> vector<8x256xf32>
    %19 = vector.extract_strided_slice %9 {offsets = [2, 0], sizes = [1, 256], strides = [1, 1]} : vector<9x256xf32> to vector<1x256xf32>
    %20 = vector.broadcast %19 : vector<1x256xf32> to vector<8x256xf32>
    %21 = arith.mulf %18, %20 : vector<8x256xf32>
    %c1_i32 = arith.constant 1 : i32
    %22 = tpu.dynamic_rotate %8 by %c1_i32 dim 1 : vector<8x256xf32>, i32 -> vector<8x256xf32>
    %23 = vector.extract_strided_slice %9 {offsets = [3, 0], sizes = [1, 256], strides = [1, 1]} : vector<9x256xf32> to vector<1x256xf32>
    %24 = vector.broadcast %23 : vector<1x256xf32> to vector<8x256xf32>
    %25 = arith.mulf %22, %24 : vector<8x256xf32>
    %c255_i32 = arith.constant 255 : i32
    %26 = tpu.dynamic_rotate %8 by %c255_i32 dim 1 : vector<8x256xf32>, i32 -> vector<8x256xf32>
    %27 = vector.extract_strided_slice %9 {offsets = [5, 0], sizes = [1, 256], strides = [1, 1]} : vector<9x256xf32> to vector<1x256xf32>
    %28 = vector.broadcast %27 : vector<1x256xf32> to vector<8x256xf32>
    %29 = arith.mulf %26, %28 : vector<8x256xf32>
    %c241_i32 = arith.constant 241 : i32
    %30 = tpu.dynamic_rotate %8 by %c241_i32 dim 1 : vector<8x256xf32>, i32 -> vector<8x256xf32>
    %31 = vector.extract_strided_slice %9 {offsets = [6, 0], sizes = [1, 256], strides = [1, 1]} : vector<9x256xf32> to vector<1x256xf32>
    %32 = vector.broadcast %31 : vector<1x256xf32> to vector<8x256xf32>
    %33 = arith.mulf %30, %32 : vector<8x256xf32>
    %c240_i32 = arith.constant 240 : i32
    %34 = tpu.dynamic_rotate %8 by %c240_i32 dim 1 : vector<8x256xf32>, i32 -> vector<8x256xf32>
    %35 = vector.extract_strided_slice %9 {offsets = [7, 0], sizes = [1, 256], strides = [1, 1]} : vector<9x256xf32> to vector<1x256xf32>
    %36 = vector.broadcast %35 : vector<1x256xf32> to vector<8x256xf32>
    %37 = arith.mulf %34, %36 : vector<8x256xf32>
    %c239_i32 = arith.constant 239 : i32
    %38 = tpu.dynamic_rotate %8 by %c239_i32 dim 1 : vector<8x256xf32>, i32 -> vector<8x256xf32>
    %39 = vector.extract_strided_slice %9 {offsets = [8, 0], sizes = [1, 256], strides = [1, 1]} : vector<9x256xf32> to vector<1x256xf32>
    %40 = vector.broadcast %39 : vector<1x256xf32> to vector<8x256xf32>
    %41 = arith.mulf %38, %40 : vector<8x256xf32>
    %42 = tpu.concatenate %13, %17, %21, %25, %8, %29, %33, %37, %41 in 0 : vector<8x256xf32>, vector<8x256xf32>, vector<8x256xf32>, vector<8x256xf32>, vector<8x256xf32>, vector<8x256xf32>, vector<8x256xf32>, vector<8x256xf32>, vector<8x256xf32> -> vector<72x256xf32>
    %c0_9 = arith.constant 0 : index
    %c0_10 = arith.constant 0 : index
    %43 = vector.load %arg5[%c0_9, %c0_10] : memref<16x72xf32, #tpu.memory_space<vmem>>, vector<16x72xf32>
    %cst_11 = arith.constant dense<0.000000e+00> : vector<16x256xf32>
    %44 = tpu.matmul %43, %42, %cst_11 {dimension_numbers = #tpu.dot_dimension_numbers<[1], [0], [0], [1], [0, 0, 1, 1], [], []>} : vector<16x72xf32>, vector<72x256xf32>, vector<16x256xf32> -> vector<16x256xf32>
    %c0_12 = arith.constant 0 : index
    %c0_13 = arith.constant 0 : index
    %45 = vector.load %arg6[%c0_12, %c0_13] : memref<16x1xf32, #tpu.memory_space<vmem>>, vector<16x1xf32>
    %46 = vector.broadcast %45 : vector<16x1xf32> to vector<16x256xf32>
    %47 = arith.addf %44, %46 : vector<16x256xf32>
    %cst_14 = arith.constant 0.000000e+00 : f32
    %48 = vector.broadcast %cst_14 : f32 to vector<16x256xf32>
    %49 = arith.maximumf %47, %48 : vector<16x256xf32>
    %c0_15 = arith.constant 0 : index
    %c0_16 = arith.constant 0 : index
    %c0_17 = arith.constant 0 : index
    %50 = vector.load %arg7[%c0_15, %c0_16, %c0_17] : memref<1x16x256xf32, #tpu.memory_space<vmem>>, vector<1x16x256xf32>
    %51 = vector.shape_cast %50 : vector<1x16x256xf32> to vector<16x256xf32>
    %52 = vector.shape_cast %49 : vector<16x256xf32> to vector<1x16x256xf32>
    tpu.vector_store %arg7[%c0_15, %c0_16, %c0_17], %52 {strides = array<i32>} : memref<1x16x256xf32, #tpu.memory_space<vmem>>, vector<1x16x256xf32>,
    return
  }
  func.func @transform_0(%arg0: i32) -> (i32, i32, i32) {
    %c0_i32 = arith.constant 0 : i32
    %c0_i32_0 = arith.constant 0 : i32
    %c0_i32_1 = arith.constant 0 : i32
    return %arg0, %c0_i32, %c0_i32_0 : i32, i32, i32
  }
  func.func @transform_1(%arg0: i32) -> (i32, i32) {
    %c0_i32 = arith.constant 0 : i32
    %c0_i32_0 = arith.constant 0 : i32
    %c0_i32_1 = arith.constant 0 : i32
    return %c0_i32, %c0_i32_0 : i32, i32
  }
  func.func @transform_2(%arg0: i32) -> (i32, i32) {
    %c0_i32 = arith.constant 0 : i32
    %c0_i32_0 = arith.constant 0 : i32
    %c0_i32_1 = arith.constant 0 : i32
    return %c0_i32, %c0_i32_0 : i32, i32
  }
  func.func @transform_3(%arg0: i32) -> (i32, i32) {
    %c0_i32 = arith.constant 0 : i32
    %c0_i32_0 = arith.constant 0 : i32
    %c0_i32_1 = arith.constant 0 : i32
    return %c0_i32, %c0_i32_0 : i32, i32
  }
  func.func @transform_4(%arg0: i32) -> (i32, i32) {
    %c0_i32 = arith.constant 0 : i32
    %c0_i32_0 = arith.constant 0 : i32
    %c0_i32_1 = arith.constant 0 : i32
    return %c0_i32, %c0_i32_0 : i32, i32
  }
  func.func @transform_5(%arg0: i32) -> (i32, i32) {
    %c0_i32 = arith.constant 0 : i32
    %c0_i32_0 = arith.constant 0 : i32
    %c0_i32_1 = arith.constant 0 : i32
    return %c0_i32, %c0_i32_0 : i32, i32
  }
  func.func @transform_6(%arg0: i32) -> (i32, i32, i32) {
    %c0_i32 = arith.constant 0 : i32
    %c0_i32_0 = arith.constant 0 : i32
    %c0_i32_1 = arith.constant 0 : i32
    return %arg0, %c0_i32, %c0_i32_0 : i32, i32, i32
  }
}

</mosaic_0001>

<bundles_post_ra>
// kernel: tpu_custom_call.1
= control target key start
LH: loop header
LB: loop body
LE: loop exit
PB: predicated region body
PF: predicated region fallthrough
CT: control target
= control target key end

     0   :  { %11 = vsyncpa [#allocation3], 0  ;;  %s1218_s0 = inlined_call_operand.hbm [shape: f32[2,4,256], index: 0, kind: input, shape index: {}]   ;;  %s1219_s1 = inlined_call_operand.vmem [shape: f32[9,256], index: 1, kind: input, shape index: {}]   ;;  %s1220_s2 = inlined_call_operand.vmem [shape: f32[8,4], index: 2, kind: input, shape index: {}]   ;;  %s1221_s3 = inlined_call_operand.vmem [shape: f32[8,1], index: 3, kind: input, shape index: {}]   ;;  %s1222_s4 = inlined_call_operand.vmem [shape: f32[16,72], index: 4, kind: input, shape index: {}]   ;;  %s1223_s5 = inlined_call_operand.vmem [shape: f32[16,1], index: 5, kind: input, shape index: {}]   ;;  %s1224_s6 = inlined_call_operand.hbm [shape: f32[2,16,256], index: 6, kind: output, shape index: {}]  }
   0x1   :  { %13 = vsyncpa [#allocation3 + $0x1], 0 }
   0x2   :  { %14 = vsyncpa [#allocation4], 0 }
   0x3   :  { %16 = vsyncpa [#allocation4 + $0x1], 0  ;;  %s950_s21 = smov 0   ;;  %s952_s22 = smov 0  }
   0x4   :  { %s954_s23 = smov 0   ;;  %s956_s24 = smov 0  }
   0x5 LB: > { %s971_s25 = sadd.s32 4294967295, %s900_s24   ;;  %s695_s26 = sadd.s32 4294967294, %s900_s24   ;;  %s900_s24 = sphi %s956_s24, %s1239_s24   ;;  %s896_s23 = sphi %s954_s23, %s1238_s23   ;;  %s892_s22 = sphi %s952_s22, %s1237_s22   ;;  %s888_s21 = sphi %s950_s21, %s1236_s21  }
   0x6   : > { %s975_s27 = sadd.s32 1, %s900_s24   ;;  %s29_s28 = sadd.s32 1, %s896_s23 }
   0x7   : > { %s26_s29 = ssub.s32 %s900_s24, %s975_s27  ;;  %p36_p0 = scmp.ne.s32.totalorder %s896_s23, %s892_s22 }
   0x8   : > { %p27_p1 = scmp.eq.s32.totalorder %s26_s29, 0  ;;  %p37_p2 = scmp.eq.s32.totalorder %s900_s24, 0 }
   0x9   : > { %p42_p3 = scmp.ne.s32.totalorder %s892_s22, %s888_s21  ;;  %p43_p4 = scmp.eq.s32.totalorder %s971_s25, 0 }
   0xa   : > { %s987_s30 = scalar_select %p27_p1, %s896_s23, %s29_s28  }
   0xb   : > { %p989_p5 = por %p37_p2, %p36_p0  ;;  %p993_p6 = por %p43_p4, %p42_p3 }
   0xc   : > { %p171_p7 = scmp.eq.s32.totalorder %s971_s25, 1  ;;  %p177_p8 = scmp.eq.s32.totalorder %s695_s26, 1 }
   0xd   : > { %p756_p10 = scmp.lt.s32.totalorder %s900_s24, 2  ;;  %s212_s11 = sand.u32 1, %s896_s23  }
   0xe   : > { %p1000_p11 = por %p171_p7, %p36_p0  ;;  %p1004_p12 = por %p177_p8, %p42_p3 }
   0xf   : > { %s716_s12 = sshll.u32 %s900_s24, 7  ;;  %s698_s13 = sshll.u32 %s212_s11, 3 }
  0x10   : > { %s1228_s9 = scalar_select %p1000_p11, 1, 0 }
  0x11   : > { %s1229_s10 = scalar_select %p1004_p12, 1, 0 }
  0x12   : > { %s1013_s16 = scalar_lea.hbm %s1218_s0, %s716_s12  ;;  %s216_s17 = scalar_lea.vmem [#allocation2], %s698_s13 }
  0x13   : > { %s224_s18 = sshll.u32 %s216_s17, 4  ;;  %p1017_p13 = pnand %p756_p10, %p989_p5  ;;  %s1021_s18 = int_to_ptr.vmem [resolvable:$true] %s224_s18 }
  0x14   : > { %s213_s20 = scalar_lea.sflag [#allocation3], %s212_s11  ;;  %s804_s26 = scalar_lea.hbm %s1013_s16, 128 }
  0x15   : > { %p805_p2 = scmp.ne.s32.totalorder %s1013_s16, %s804_s26  ;;  %p806_p3 = pneg %p1017_p13 }
  0x16   : > { %s809_s7 = scalar_lea.hbm %s1218_s0, 256  ;;  %p810_p5 = scmp.lt.u32.totalorder %s1013_s16, %s1218_s0 }
  0x17   : > { %p807_p4 = pnand %p806_p3, %p805_p2  ;;  %p811_p8 = scmp.lt.u32.totalorder %s809_s7, %s804_s26 }
  0x18   : > { %p813_p9 = scmp.lt.u32.totalorder %s804_s26, %s1013_s16 }
  0x19   : > { %p808_p7 = pneg %p807_p4  ;;  %p812_p10 = por %p811_p8, %p810_p5 }
  0x1b   : > { %p814_p0 = por %p813_p9, %p812_p10 }
  0x1d   : > { %p815_p1 = pnand %p814_p0, %p808_p7 }
  0x1f   : > { %818 = shalt.err (!%p815_p1)
}
  0x20   : > { %s819_s11 = scalar_lea.vmem %s1021_s18, 128  ;;  %s902_s14 = smov [#allocation2]  }
  0x21   : > { %p820_p2 = scmp.ne.s32.totalorder %s1021_s18, %s819_s11  ;;  %s824_s15 = sshll.u32 %s902_s14, 4  ;;  %s825_s15 = int_to_ptr.vmem [resolvable:$false] %s824_s15 }
  0x22   : > { %s826_s17 = scalar_lea.vmem %s825_s15, 256  ;;  %p827_p11 = scmp.lt.s32.totalorder %s1021_s18, %s825_s15 }
  0x23   : > { %p822_p4 = pnand %p820_p2, %p806_p3  ;;  %p828_p5 = scmp.lt.s32.totalorder %s826_s17, %s819_s11 }
  0x25   : > { %p823_p12 = pneg %p822_p4  ;;  %p829_p8 = por %p828_p5, %p827_p11 }
  0x27   : > { %p830_p9 = pnand %p829_p8, %p823_p12 }
  0x29   : > { %833 = shalt.err (!%p830_p9)
}
  0x2a   : > { %751 = dma.hbm_to_vmem [thread:$0]  (!%p1017_p13), %s1013_s16, 128, %s1021_s18, %s213_s20  }
  0x2b   : > { %p1231_p0 = scmp.lt.s32.totalorder %s900_s24, 3  ;;  %p1232_p1 = scmp.ge.s32.totalorder %s900_s24, 1 }
  0x2d   : > { %p230_p3 = pnand %p1232_p1, %p1231_p0 }
  0x2e   : > { %s1055_s26 = sand.u32 (!%p230_p3), 1, %s892_s22  }
  0x2f   : > { %233 = sbr.rel (%p230_p3) target bundleno = 658 (0x292), region = 44  ;;  %s702_s28 = sshll.u32 (!%p230_p3), %s1055_s26, 3 }
  0x30   : > { %s236_s29 = scalar_lea.sflag (!%p230_p3), [#allocation3], %s1055_s26  ;;  %s239_s7 = scalar_lea.vmem (!%p230_p3), [#allocation2], %s702_s28 }
  0x36   : > { %879 = dma.done.wait (%p993_p6), %s236_s29, 128  }
  0x37   : > { %881 = vsyncadd (%p993_p6), %s236_s29, 4294967168  ;;  %v903_v0 = vmov 0.0   ;;  %v904_v1 = vmov 0   ;;  %v268_v2 = vld [vmem:[%s239_s7] sm:$0xff]  ;;  %vm282_vm0 = vcmask 1043456   ;;  %vm278_vm1 = vcmask 31744  }
  0x38   : > { %351 = vmatprep.mubr.f32.mxu0 %v903_v0  ;;  %801 = vset.pattern.permute.xlu0 %v904_v1  ;;  %v270_v3 = vld [vmem:[%s1221_s3] sm:$0xff]  ;;  %v277_v4 = vcombine.high %v268_v2, %v268_v2  ;;  %s905_s8 = smov 16   ;;  %s906_s12 = smov 17   ;;  %v505_v13 = vld [vmem:[%s1223_s5 + $0x8] sm:$0xff]  ;;  %v368_v15 = vlaneseq  ;;  %vm516_vm10 = vcmask 588800  }
  0x39   : > { %593 = vmatprep.mubr.f32.mxu1 %v903_v0  ;;  %802 = vset.pattern.permute.xlu1 %v904_v1  ;;  %v269_v5 = vld [vmem:[%s1220_s2] sm:$0xff]  ;;  %s907_s13 = smov 15   ;;  %s908_s11 = smov 1   ;;  %v1110_v24 = vld [vmem:[%s1219_s1 + $0x8] sm:$0xff] }
  0x3a   : > { %273 = vperm.xlu0 %801, %v270_v3   ;;  %704 = vmatprep.subr.msk.mxu0 %vm282_vm0, %v277_v4  ;;  %s909_s14 = smov 127   ;;  %s910_s15 = smov 113   ;;  %v504_v14 = vld [vmem:[%s1223_s5] sm:$0xff]  ;;  %v1097_v18 = vshrl.u32 %v368_v15, 7  ;;  %v1099_v19 = vand.u32 127, %v368_v15 }
  0x3b   : > { %705 = vmatpush1.msk.msra.mxu0 %vm282_vm0, %v268_v2  ;;  %s911_s17 = smov 112   ;;  %s912_s28 = smov 111   ;;  %v1105_v23 = vld [vmem:[%s1219_s1] sm:$0xff] }
  0x3c   : > { %706 = vmatmul.mubr.msk.f32.vlgmr.msra.gmra.mrb[0].mxu0 %vm278_vm1, %v269_v5  ;;  %v392_v21 = vsub.s32 1, %v1097_v18  ;;  %vm387_vm2 = vcmp.lt.s32.totalorder %v1099_v19, 16  ;;  %v375_v25 = vsub.s32 0, %v1097_v18  ;;  %v426_v26 = vsub.s32 3, %v1097_v18  ;;  %s703_s18 = sshll.u32 %s1055_s26, 5  ;;  %p1233_p11 = scmp.ne.s32.totalorder %s1228_s9, 0 }
  0x3d   : > { %587 = vmatprep.mubr.f32.mxu0 %v903_v0  ;;  %v409_v27 = vsub.s32 2, %v1097_v18  ;;  %v443_v32 = vsub.s32 5, %v1097_v18  ;;  %vm404_vm3 = vcmp.lt.s32.totalorder %v1099_v19, 15  ;;  %vm370_vm4 = vcmp.lt.s32.totalorder %v1099_v19, 17  ;;  %s267_s19 = scalar_lea.vmem [#allocation5], %s703_s18 }
  0x3e   : > { %v393_v28 = vrot.slane %v1105_v23, %v392_v21  ;;  %v397_v29 = vrot.slane %v1110_v24, %v392_v21  ;;  %v376_v35 = vrot.slane %v1105_v23, %v375_v25  ;;  %v380_v36 = vrot.slane %v1110_v24, %v375_v25  ;;  %s622_s20 = sshll.u32 %s267_s19, 4  ;;  %s1168_s20 = int_to_ptr.vmem [resolvable:$true] %s622_s20 }
  0x3f   : > { %vm421_vm5 = vcmp.lt.s32.totalorder %v1099_v19, 1  ;;  %v431_v37 = vrot.slane %v1110_v24, %v426_v26  ;;  %v414_v38 = vrot.slane %v1110_v24, %v409_v27  ;;  %v427_v39 = vrot.slane %v1105_v23, %v426_v26 }
  0x40   : > { %vm438_vm6 = vcmp.lt.s32.totalorder %v1099_v19, 127  ;;  %v448_v44 = vrot.slane %v1110_v24, %v443_v32  ;;  %v410_v53 = vrot.slane %v1105_v23, %v409_v27  ;;  %v444_v61 = vrot.slane %v1105_v23, %v443_v32 }
  0x41   : > { %v460_v63 = vsub.s32 6, %v1097_v18  ;;  %v477_v3 = vsub.s32 7, %v1097_v18  ;;  %vm455_vm7 = vcmp.lt.s32.totalorder %v1099_v19, 113  ;;  %vm472_vm8 = vcmp.lt.s32.totalorder %v1099_v19, 112 }
  0x42   : > { %vm489_vm9 = vcmp.lt.s32.totalorder %v1099_v19, 111 }
  0x43   : > { %v482_v15 = vrot.slane %v1110_v24, %v477_v3 }
  0xb9   : > { %v274_v6 = vpop.permute.xlu0 %273 }
 0x10f   : > { %v353_v7 = vpop.f32.mrb[0].mxu0 }
 0x110   : > { %v354_v8 = vadd.f32 %v353_v7, %v274_v6  ;;  %v355_v9 = vpop.f32.mrb[1].mxu0 }
 0x111   : > { %v356_v11 = vadd.f32 %v355_v9, %v274_v6  ;;  %v461_v9 = vrot.slane %v1105_v23, %v460_v63 }
 0x112   : > { %v1069_v10 = vmax.f32 %v354_v8, 0.0 }
 0x113   : > { %v1074_v12 = vmax.f32 %v356_v11, 0.0  ;;  %v465_v11 = vrot.slane %v1110_v24, %v460_v63  ;;  %v708_v24 = vld [vmem:[%s1219_s1 + $0x18] ss:$0 sm:$0xff] }
 0x114   : > { %383 = vrot.lane.b32.xlu1 %v1069_v10, %s905_s8  ;;  %364 = vrot.lane.b32.xlu0 %v1069_v10, %s906_s12 }
 0x118   : > { %400 = vrot.lane.b32.xlu1 %v1069_v10, %s907_s13  ;;  %385 = vrot.lane.b32.xlu0 %v1074_v12, %s905_s8 }
 0x11c   : > { %417 = vrot.lane.b32.xlu1 %v1069_v10, %s908_s11  ;;  %402 = vrot.lane.b32.xlu0 %v1074_v12, %s907_s13 }
 0x120   : > { %366 = vrot.lane.b32.xlu1 %v1074_v12, %s906_s12  ;;  %419 = vrot.lane.b32.xlu0 %v1074_v12, %s908_s11  ;;  %s717_s12 = sshll.u32 %s971_s25, 9  ;;  %s609_s25 = scalar_lea.sflag [#allocation4], %s1055_s26 }
 0x124   : > { %434 = vrot.lane.b32.xlu1 %v1069_v10, %s909_s14  ;;  %436 = vrot.lane.b32.xlu0 %v1074_v12, %s909_s14  ;;  %s1173_s14 = scalar_lea.hbm %s1224_s6, %s717_s12 }
 0x128   : > { %451 = vrot.lane.b32.xlu1 %v1069_v10, %s910_s15  ;;  %453 = vrot.lane.b32.xlu0 %v1074_v12, %s910_s15  ;;  %s834_s15 = scalar_lea.vmem %s1168_s20, 512 }
 0x129   : > { %p835_p6 = scmp.ne.s32.totalorder %s1168_s20, %s834_s15 }
 0x12b   : > { %p836_p12 = pnand %p835_p6, %p1233_p11 }
 0x12c   : > { %468 = vrot.lane.b32.xlu1 %v1069_v10, %s911_s17  ;;  %470 = vrot.lane.b32.xlu0 %v1074_v12, %s911_s17  ;;  %s913_s17 = smov [#allocation5]  }
 0x12d   : > { %p837_p13 = pneg %p836_p12 }
 0x130   : > { %485 = vrot.lane.b32.xlu1 %v1069_v10, %s912_s28  ;;  %487 = vrot.lane.b32.xlu0 %v1074_v12, %s912_s28  ;;  %s838_s28 = sshll.u32 %s913_s17, 4  ;;  %s839_s28 = int_to_ptr.vmem [resolvable:$false] %s838_s28 }
 0x131   : > { %s840_s29 = scalar_lea.vmem %s839_s28, 1024  ;;  %p841_p7 = scmp.lt.s32.totalorder %s1168_s20, %s839_s28 }
 0x132   : > { %p842_p10 = scmp.lt.s32.totalorder %s840_s29, %s834_s15 }
 0x134   : > { %513 = vperm.xlu0 %801, %v505_v13   ;;  %508 = vperm.xlu1 %802, %v504_v14   ;;  %v478_v14 = vrot.slane %v1105_v23, %v477_v3  ;;  %p843_p2 = por %p842_p10, %p841_p7 }
 0x136   : > { %p844_p4 = pnand %p843_p2, %p837_p13 }
 0x186   : > { %v384_v16 = vpop.permute.xlu1 %383  ;;  %v365_v17 = vpop.permute.xlu0 %364 }
 0x18a   : > { %v401_v20 = vpop.permute.xlu1 %400  ;;  %v386_v22 = vpop.permute.xlu0 %385 }
 0x18b   : > { %v388_v33 = vsel %vm387_vm2, %v384_v16, %v386_v22  ;;  %v389_v34 = vsel %vm387_vm2, %v386_v22, %v384_v16 }
 0x18c   : > { %v398_v40 = vmul.f32 %v393_v28, %v389_v34  ;;  %v399_v41 = vmul.f32 %v397_v29, %v388_v33 }
 0x18e   : > { %v418_v30 = vpop.permute.xlu1 %417  ;;  %v403_v31 = vpop.permute.xlu0 %402 }
 0x18f   : > { %v405_v45 = vsel %vm404_vm3, %v401_v20, %v403_v31  ;;  %v406_v54 = vsel %vm404_vm3, %v403_v31, %v401_v20 }
 0x190   : > { %v416_v55 = vmul.f32 %v414_v38, %v405_v45  ;;  %v415_v4 = vmul.f32 %v410_v53, %v406_v54 }
 0x192   : > { %v367_v42 = vpop.permute.xlu1 %366  ;;  %v420_v43 = vpop.permute.xlu0 %419 }
 0x193   : > { %v371_v46 = vsel %vm370_vm4, %v365_v17, %v367_v42  ;;  %v372_v47 = vsel %vm370_vm4, %v367_v42, %v365_v17  ;;  %v422_v48 = vsel %vm421_vm5, %v418_v30, %v420_v43  ;;  %v423_v51 = vsel %vm421_vm5, %v420_v43, %v418_v30 }
 0x194   : > { %v381_v49 = vmul.f32 %v376_v35, %v372_v47  ;;  %v382_v50 = vmul.f32 %v380_v36, %v371_v46  ;;  %v433_v52 = vmul.f32 %v431_v37, %v422_v48  ;;  %v432_v60 = vmul.f32 %v427_v39, %v423_v51  ;;  %v502_v35 = vld [vmem:[%s1222_s4] sm:$0xff]  ;;  %v503_v36 = vld [vmem:[%s1222_s4 + $0x8] sm:$0xff] }
 0x196   : > { %v720_v56 = vpack.c.bf16 %v398_v40, %v381_v49  ;;  %v435_v57 = vpop.permute.xlu1 %434  ;;  %v437_v58 = vpop.permute.xlu0 %436  ;;  %v718_v59 = vpack.c.bf16 %v399_v41, %v382_v50  ;;  %v722_v2 = vpack.c.bf16 %v433_v52, %v416_v55  ;;  %v724_v7 = vpack.c.bf16 %v432_v60, %v415_v4 }
 0x197   : > { %v440_v62 = vsel %vm438_vm6, %v437_v58, %v435_v57  ;;  %v439_v0 = vsel %vm438_vm6, %v435_v57, %v437_v58 }
 0x198   : > { %v450_v1 = vmul.f32 %v448_v44, %v440_v62  ;;  %719 = vmatprep.subr.bf16.mxu0 %v718_v59  ;;  %734 = vmatprep.subr.bf16.mxu1 %v718_v59  ;;  %v449_v8 = vmul.f32 %v444_v61, %v439_v0 }
 0x199   : > { %721 = vmatpush1.bf16.msra.mxu0 %v720_v56  ;;  %739 = vmatpush1.bf16.msra.mxu1 %v720_v56 }
 0x19a   : > { %v452_v5 = vpop.permute.xlu1 %451  ;;  %723 = vmatprep.subr.bf16.mxu0 %v722_v2  ;;  %735 = vmatprep.subr.bf16.mxu1 %v722_v2  ;;  %v454_v6 = vpop.permute.xlu0 %453  ;;  %v726_v13 = vpack.c.bf16 %v450_v1, %v1074_v12  ;;  %v728_v21 = vpack.c.bf16 %v449_v8, %v1069_v10  ;;  %v707_v10 = vld [vmem:[%s1219_s1 + $0x10] ss:$0 sm:$0xff] }
 0x19b   : > { %v456_v16 = vsel %vm455_vm7, %v452_v5, %v454_v6  ;;  %v457_v17 = vsel %vm455_vm7, %v454_v6, %v452_v5 }
 0x19c   : > { %v466_v12 = vmul.f32 %v461_v9, %v456_v16  ;;  %v467_v26 = vmul.f32 %v465_v11, %v457_v17 }
 0x19d   : > { %725 = vmatpush1.bf16.msra.mxu0 %v724_v7  ;;  %740 = vmatpush1.bf16.msra.mxu1 %v724_v7 }
 0x19e   : > { %v469_v18 = vpop.permute.xlu1 %468  ;;  %727 = vmatprep.subr.bf16.mxu0 %v726_v13  ;;  %736 = vmatprep.subr.bf16.mxu1 %v726_v13  ;;  %v471_v20 = vpop.permute.xlu0 %470 }
 0x19f   : > { %v473_v22 = vsel %vm472_vm8, %v469_v18, %v471_v20  ;;  %v474_v25 = vsel %vm472_vm8, %v471_v20, %v469_v18 }
 0x1a0   : > { %v483_v27 = vmul.f32 %v478_v14, %v473_v22  ;;  %v484_v23 = vmul.f32 %v482_v15, %v474_v25 }
 0x1a1   : > { %729 = vmatpush1.bf16.msra.mxu0 %v728_v21  ;;  %741 = vmatpush1.bf16.msra.mxu1 %v728_v21 }
 0x1a2   : > { %v732_v28 = vpack.c.bf16 %v483_v27, %v466_v12  ;;  %v486_v29 = vpop.permute.xlu1 %485  ;;  %v488_v30 = vpop.permute.xlu0 %487  ;;  %v730_v31 = vpack.c.bf16 %v484_v23, %v467_v26 }
 0x1a3   : > { %v491_v32 = vsel %vm489_vm9, %v488_v30, %v486_v29  ;;  %v490_v19 = vsel %vm489_vm9, %v486_v29, %v488_v30 }
 0x1a4   : > { %v501_v33 = vmul.f32 %v708_v24, %v491_v32  ;;  %731 = vmatprep.subr.bf16.mxu0 %v730_v31  ;;  %737 = vmatprep.subr.bf16.mxu1 %v730_v31  ;;  %v500_v34 = vmul.f32 %v707_v10, %v490_v19 }
 0x1a5   : > { %733 = vmatpush1.bf16.msra.mxu0 %v732_v28  ;;  %742 = vmatpush1.bf16.msra.mxu1 %v732_v28 }
 0x1a6   : > { %539 = vmatprep.subr.mxu0 %v501_v33  ;;  %738 = vmatprep.subr.mxu1 %v501_v33 }
 0x1a9   : > { %540 = vmatpush1.msra.mxu0 %v500_v34  ;;  %743 = vmatpush1.msra.mxu1 %v500_v34 }
 0x1aa   : > { %709 = vmatmul.mubr.msk.f32.vlgmr.msra.gmra.mrb[2].mxu0 %vm516_vm10, %v502_v35  ;;  %710 = vmatmul.mubr.msk.f32.vlgmr.msra.gmra.mrb[0].mxu1 %vm516_vm10, %v503_v36 }
 0x1b3   : > { %v509_v37 = vpop.permute.xlu1 %508  ;;  %v514_v38 = vpop.permute.xlu0 %513 }
 0x27d   : > { %v589_v39 = vpop.f32.mrb[2].mxu0  ;;  %v595_v40 = vpop.f32.mrb[0].mxu1 }
 0x27e   : > { %v590_v41 = vadd.f32 %v589_v39, %v509_v37  ;;  %v596_v42 = vadd.f32 %v595_v40, %v514_v38  ;;  %v591_v43 = vpop.f32.mrb[3].mxu0  ;;  %v597_v44 = vpop.f32.mrb[1].mxu1 }
 0x27f   : > { %v592_v45 = vadd.f32 %v591_v43, %v509_v37  ;;  %v598_v46 = vadd.f32 %v597_v44, %v514_v38 }
 0x280   : > { %v600_v47 = vmax.f32 %v590_v41, 0.0  ;;  %v602_v48 = vmax.f32 %v596_v42, 0.0 }
 0x281   : > { %v601_v49 = vmax.f32 %v592_v45, 0.0  ;;  %v603_v50 = vmax.f32 %v598_v46, 0.0 }
 0x282   : > { %604 = vst [vmem:[%s267_s19] sm:$0xff] %v600_v47  ;;  %606 = vst [vmem:[%s267_s19 + $0x10] sm:$0xff] %v602_v48 }
 0x283   : > { %605 = vst [vmem:[%s267_s19 + $0x8] sm:$0xff] %v601_v49  ;;  %607 = vst [vmem:[%s267_s19 + $0x18] sm:$0xff] %v603_v50 }
 0x284   : > { %847 = shalt.err (!%p844_p4)
}
 0x285   : > { %s848_s7 = scalar_lea.hbm %s1173_s14, 512  ;;  %s852_s19 = scalar_lea.hbm %s1224_s6, 1024 }
 0x286   : > { %p849_p5 = scmp.ne.s32.totalorder %s1173_s14, %s848_s7  ;;  %p853_p0 = scmp.lt.u32.totalorder %s1173_s14, %s1224_s6 }
 0x287   : > { %p854_p1 = scmp.lt.u32.totalorder %s852_s19, %s848_s7  ;;  %p856_p6 = scmp.lt.u32.totalorder %s848_s7, %s1173_s14 }
 0x288   : > { %p850_p8 = pnand %p849_p5, %p1233_p11 }
 0x289   : > { %p855_p3 = por %p854_p1, %p853_p0 }
 0x28a   : > { %p851_p9 = pneg %p850_p8 }
 0x28b   : > { %p857_p12 = por %p856_p6, %p855_p3 }
 0x28d   : > { %p858_p13 = pnand %p857_p12, %p851_p9 }
 0x28f   : > { %861 = shalt.err (!%p858_p13)
}
 0x290   : > { %s914_s11 = smov 256  }
 0x291   : > { %746 = dma.vmem_to_hbm [thread:$0]  (%p1233_p11), %s1168_s20, 512, %s1173_s14, %s609_s25, %s914_s11, %s914_s11, %s905_s8  }
 0x292 PF: > { %s637_s15 = sand.u32 1, %s888_s21   ;;  %p1234_p7 = scmp.ne.s32.totalorder %s1229_s10, 0 }
 0x293   : > { %p1235_p10 = scmp.ge.s32.totalorder %s900_s24, 2  ;;  %s638_s17 = scalar_lea.sflag [#allocation4], %s637_s15 }
 0x295   : > { %p753_p2 = pnand %p1235_p10, %p1234_p7 }
 0x297   : > { %883 = dma.done.wait (!%p753_p2), %s638_s17, 512  }
 0x298   : > { %885 = vsyncadd (!%p753_p2), %s638_s17, 4294966784  ;;  %p19_p4 = scmp.ge.s32.totalorder %s975_s27, 4   ;;  %s1236_s21 = smov %s892_s22 }
 0x299   : > { %s1237_s22 = smov %s896_s23  ;;  %s1238_s23 = smov %s987_s30 }
 0x29a   : > { %s1239_s24 = smov %s975_s27  ;;  %21 = sbr.rel (!%p19_p4) target bundleno = 5 (0x5), region = 89 }
 0x2a1   :  { %643 = vsyncpa [#allocation3], 1 }
 0x2a2   :  { %645 = vsyncpa [#allocation3 + $0x1], 1 }
 0x2a3   :  { %646 = vsyncpa [#allocation4], 1 }
 0x2a4   :  { %648 = vsyncpa [#allocation4 + $0x1], 1 }

</bundles_post_ra>
